<compile_context>
chip_gen: v5e
topology: v5e:2x2
jax: 0.10.0
libtpu: 0.0.40
codegen_flags: <defaults>
</compile_context>

<pallas_src>
import functools

import jax
import jax.numpy as jnp
from jax import lax
from jax.experimental import pallas as pl
from jax.experimental.pallas import tpu as pltpu


def _round_up(x, m):
    return (x + m - 1) // m * m


def _gelu_exact(x):
    # nn.GELU() default is the exact (erf-based) formulation; computed in f32.
    return 0.5 * x * (1.0 + lax.erf(x * jnp.float32(0.7071067811865476)))


# ----------------------------------------------------------------------------
# Hardware detection (import-time, best-effort; falls back to safe defaults).
# ----------------------------------------------------------------------------
def _detect_tpu():
    gen = None
    try:
        kind = jax.devices()[0].device_kind.lower()
        for g in (7, 6, 5, 4):
            if "v%d" % g in kind:
                gen = g
                break
    except Exception:
        pass
    vmem = None
    try:
        info = pltpu.get_tpu_info()
        vmem = int(info.vmem_capacity_bytes)
    except Exception:
        vmem = None
    if vmem is None:
        vmem = 64 * 2**20 if gen == 7 else 128 * 2**20
    return gen, vmem


_TPU_GEN, _VMEM_CAPACITY = _detect_tpu()


def _default_tiles(gen):
    if gen == 5:
        return 256, 1024      # v5e: already ~compute-bound at tm=256
    if gen == 6:
        return 1024, 1024     # v6e: intensity ~tm FLOP/weight-byte vs ~650 roofline
    if gen == 7:
        return 512, 512       # v7x: 64 MiB/TC VMEM
    return 512, 512           # unknown generation: conservative


# ----------------------------------------------------------------------------
# Kernel
# ----------------------------------------------------------------------------
def feed_forward_kernel(x_ref, w1_ref, b1_ref, w2_ref, b2_ref, o_ref, acc_ref):
    # Grid = (row tiles [parallel], I tiles [arbitrary, reduction]).
    # x_ref:  (tm, Hp)   bf16 row tile (constant across j)
    # w1_ref: (Hp, ti)   bf16 W1 column tile
    # b1_ref: (1, ti)    f32
    # w2_ref: (ti, Hp)   bf16 W2 row tile
    # b2_ref: (1, Hp)    f32
    # o_ref:  (tm, Hp)
    # acc_ref:(tm, Hp)   f32 VMEM accumulator
    j = pl.program_id(1)

    @pl.when(j == 0)
    def _init():
        # Seed the accumulator with the (broadcast) output bias: the init pass
        # writes the whole tile anyway, so the final-step bias add disappears.
        acc_ref[...] = jnp.broadcast_to(b2_ref[...], acc_ref.shape)

    # ---- w_1 slice: x @ W1[:, j*ti:(j+1)*ti] + b1 (MXU, f32 accumulation) ----
    h = jnp.dot(x_ref[...], w1_ref[...], preferred_element_type=jnp.float32)
    h = _gelu_exact(h + b1_ref[...])

    # ---- Dropout: identity at inference (eval mode). ----
    # TODO(synk): training-mode dropout (pltpu.prng_seed/prng_random_bits mask)
    # not emitted.

    # ---- w_2 slice: accumulate h_tile @ W2[j*ti:(j+1)*ti, :] ----
    acc_ref[...] += jnp.dot(h.astype(w2_ref.dtype), w2_ref[...],
                            preferred_element_type=jnp.float32)

    @pl.when(j == pl.num_programs(1) - 1)
    def _finish():
        o_ref[...] = acc_ref[...].astype(o_ref.dtype)


def _weight_spec(shape, index_map, nbuf):
    # Deeper weight pipelining (v6e) with a safe fallback if the kwarg is
    # unavailable in this JAX version.
    if nbuf > 2:
        try:
            return pl.BlockSpec(shape, index_map, pipeline_mode=pl.Buffered(nbuf))
        except TypeError:
            pass
    return pl.BlockSpec(shape, index_map)


# ----------------------------------------------------------------------------
# Wrapper
# ----------------------------------------------------------------------------
@functools.partial(jax.jit, static_argnames=("tm", "ti", "compute_dtype"))
def feed_forward(x, w1, b1, w2, b2, *, tm=None, ti=None,
                 compute_dtype=jnp.bfloat16):
    """x: [batch, seq, hidden]; w1: [H, I]; b1: [I]; w2: [I, H]; b2: [H]."""
    B, S, H = x.shape
    I = w1.shape[1]
    M = B * S
    out_dtype = x.dtype
    gen = _TPU_GEN

    LANE = 128
    H_pad = _round_up(H, LANE)
    I_pad0 = _round_up(I, LANE)
    M_pad0 = _round_up(M, 8)

    # --- Generation-aware tile selection -----------------------------------
    tm_req, ti_req = _default_tiles(gen)
    if tm is not None:
        tm_req = tm
    if ti is not None:
        ti_req = ti

    tm_eff = min(tm_req, M_pad0)
    # v7x megacore: make sure grid[0] >= 2 so both TensorCores get row tiles.
    if gen == 7 and tm_eff >= M_pad0 and M_pad0 >= 16:
        tm_eff = _round_up((M_pad0 + 1) // 2, 8)
    ti_eff = min(ti_req, I_pad0)

    nbuf_w = 3 if gen == 6 else 2   # deeper weight stream only on v6e

    cd = jnp.dtype(compute_dtype).itemsize
    od = jnp.dtype(out_dtype).itemsize

    def vmem_est(tm_e, ti_e, nb_w):
        return (2 * tm_e * H_pad * cd            # x tile (double-buffered)
                + nb_w * H_pad * ti_e * cd       # W1 tiles
                + nb_w * ti_e * H_pad * cd       # W2 tiles
                + 2 * (ti_e + H_pad) * 4         # biases
                + 2 * tm_e * H_pad * od          # output tiles
                + tm_e * H_pad * 4               # f32 accumulator scratch
                + tm_e * ti_e * (4 + cd))        # h intermediate (f32 + cast)

    budget = int(0.85 * _VMEM_CAPACITY)
    # Shrink-to-fit: drop the extra weight buffer first, then ti, then tm.
    while vmem_est(tm_eff, ti_eff, nbuf_w) > budget:
        if nbuf_w > 2:
            nbuf_w = 2
        elif ti_eff > 256:
            ti_eff = max(256, ti_eff // 2)
        elif tm_eff > 128:
            tm_eff = max(128, tm_eff // 2)
        else:
            break

    # Re-align tiles to hardware granularity after shrinking.
    tm_eff = max(8, (tm_eff // 8) * 8)
    ti_eff = max(LANE, (ti_eff // LANE) * LANE)
    ti_eff = min(ti_eff, I_pad0)

    M_pad = _round_up(M_pad0, tm_eff)
    I_pad = _round_up(I_pad0, ti_eff)

    # --- Wrapper-side padding / casting (skipped when already aligned) -----
    x2d = x.reshape(M, H)
    if x2d.dtype != compute_dtype:
        x2d = x2d.astype(compute_dtype)
    if (M_pad, H_pad) != (M, H):
        x2d = jnp.pad(x2d, ((0, M_pad - M), (0, H_pad - H)))

    w1p = w1 if w1.dtype == compute_dtype else w1.astype(compute_dtype)
    if (H_pad, I_pad) != w1.shape:
        w1p = jnp.pad(w1p, ((0, H_pad - H), (0, I_pad - I)))
    w2p = w2 if w2.dtype == compute_dtype else w2.astype(compute_dtype)
    if (I_pad, H_pad) != w2.shape:
        w2p = jnp.pad(w2p, ((0, I_pad - I), (0, H_pad - H)))

    b1p = b1.astype(jnp.float32)
    if I_pad != I:
        b1p = jnp.pad(b1p, (0, I_pad - I))
    b1p = b1p.reshape(1, I_pad)
    b2p = b2.astype(jnp.float32)
    if H_pad != H:
        b2p = jnp.pad(b2p, (0, H_pad - H))
    b2p = b2p.reshape(1, H_pad)

    grid = (M_pad // tm_eff, I_pad // ti_eff)
    n_row_tiles = grid[0]

    est = vmem_est(tm_eff, ti_eff, nbuf_w)
    vmem_limit = int(min(budget, max(int(1.25 * est) + (4 << 20), 32 << 20)))

    # Weights are re-streamed once per row tile (the dominant traffic term).
    cost = pl.CostEstimate(
        flops=4 * M_pad * H_pad * I_pad,                       # two matmuls
        transcendentals=M_pad * I_pad,                         # erf per interm. elem
        bytes_accessed=(M_pad * H_pad * cd                     # x read
                        + n_row_tiles * 2 * H_pad * I_pad * cd # W1 + W2 re-streamed
                        + n_row_tiles * (I_pad + H_pad) * 4    # biases
                        + M_pad * H_pad * od),                 # output write
    )

    out = pl.pallas_call(
        feed_forward_kernel,
        out_shape=jax.ShapeDtypeStruct((M_pad, H_pad), out_dtype),
        grid_spec=pltpu.PrefetchScalarGridSpec(
            num_scalar_prefetch=0,
            grid=grid,
            in_specs=[
                pl.BlockSpec((tm_eff, H_pad), lambda i, j: (i, 0)),       # x rows
                _weight_spec((H_pad, ti_eff), lambda i, j: (0, j), nbuf_w),  # W1
                pl.BlockSpec((1, ti_eff), lambda i, j: (0, j)),           # b1 tile
                _weight_spec((ti_eff, H_pad), lambda i, j: (j, 0), nbuf_w),  # W2
                pl.BlockSpec((1, H_pad), lambda i, j: (0, 0)),            # b2
            ],
            out_specs=pl.BlockSpec((tm_eff, H_pad), lambda i, j: (i, 0)),
            scratch_shapes=[pltpu.VMEM((tm_eff, H_pad), jnp.float32)],
        ),
        compiler_params=pltpu.CompilerParams(
            dimension_semantics=("parallel", "arbitrary"),
            vmem_limit_bytes=vmem_limit,
        ),
        cost_estimate=cost,
    )(x2d, w1p, b1p, w2p, b2p)

    if (M_pad, H_pad) != (M, H):
        out = out[:M, :H]
    return out.reshape(B, S, H)


# ----------------------------------------------------------------------------
# Reference / demo
# ----------------------------------------------------------------------------
def _xavier_uniform(key, fan_in, fan_out, dtype=jnp.float32):
    # Matches torch.nn.init.xavier_uniform_ (gain=1).
    limit = jnp.sqrt(6.0 / (fan_in + fan_out))
    return jax.random.uniform(key, (fan_in, fan_out), dtype=dtype,
                              minval=-limit, maxval=limit)


def _reference(x, w1, b1, w2, b2, compute_dtype=jnp.float32):
    x_ = x.astype(compute_dtype)
    h = jnp.dot(x_, w1.astype(compute_dtype),
                preferred_element_type=jnp.float32) + b1
    h = _gelu_exact(h)
    y = jnp.dot(h.astype(compute_dtype), w2.astype(compute_dtype),
                preferred_element_type=jnp.float32) + b2
    return y.astype(x.dtype)


if __name__ == "__main__":
    # config: hidden_size=32, intermediate_size=64, hidden_dropout_prob=0.1 (eval)
    B, S, H, I = 2, 8, 32, 64

    key = jax.random.PRNGKey(0)
    kx, k1, k2 = jax.random.split(key, 3)

    x = jax.random.normal(kx, (B, S, H), dtype=jnp.float32)
    # Stored as (in, out) == transpose of PyTorch's (out, in); xavier_uniform
    # is symmetric in fan_in/fan_out so the distribution matches.
    w1 = _xavier_uniform(k1, H, I)
    b1 = jnp.zeros((I,), jnp.float32)
    w2 = _xavier_uniform(k2, I, H)
    b2 = jnp.zeros((H,), jnp.float32)

    out = feed_forward(x, w1, b1, w2, b2)
    out = jax.block_until_ready(out)
    assert out.shape == (B, S, H)
    assert jnp.all(jnp.isfinite(out))

    # Tight check vs a reference that uses the same bf16 matmul inputs.
    ref_bf16 = _reference(x, w1, b1, w2, b2, compute_dtype=jnp.bfloat16)
    assert jnp.allclose(out, ref_bf16, atol=2e-3, rtol=2e-3), \
        "mismatch vs bf16-matched reference"

    # Loose check vs the full-f32 reference (bf16 operand rounding only).
    ref_f32 = _reference(x, w1, b1, w2, b2, compute_dtype=jnp.float32)
    assert jnp.allclose(out, ref_f32, atol=5e-2, rtol=5e-2), \
        "mismatch vs f32 reference"

    print("KERNEL_OK")
</pallas_src>

<mosaic_0001>
module attributes {stable_mosaic.version = 11 : i64} {
  func.func @feed_forward_kernel(%arg0: i32, %arg1: i32, %arg2: memref<16x128xbf16, #tpu.memory_space<vmem>>, %arg3: memref<128x128xbf16, #tpu.memory_space<vmem>>, %arg4: memref<1x128xf32, #tpu.memory_space<vmem>>, %arg5: memref<128x128xbf16, #tpu.memory_space<vmem>>, %arg6: memref<1x128xf32, #tpu.memory_space<vmem>>, %arg7: memref<16x128xf32, #tpu.memory_space<vmem>>, %arg8: memref<16x128xf32, #tpu.memory_space<vmem>>) attributes {dimension_semantics = [#tpu.dimension_semantics<parallel>, #tpu.dimension_semantics<arbitrary>], iteration_bounds = array<i64: 1, 1>, scalar_prefetch = 0 : i64, scratch_operands = 1 : i64, tpu.core_type = #tpu.core_type<tc>, window_params = [{transform_indices = @transform_0, window_bounds = array<i64: 16, 128>}, {transform_indices = @transform_1, window_bounds = array<i64: 128, 128>}, {transform_indices = @transform_2, window_bounds = array<i64: 1, 128>}, {transform_indices = @transform_3, window_bounds = array<i64: 128, 128>}, {pipeline_mode = #tpu.pipeline_mode<synchronous>, transform_indices = @transform_4, window_bounds = array<i64: 1, 128>}, {transform_indices = @transform_5, window_bounds = array<i64: 16, 128>}]} {
    %c0_i32 = arith.constant 0 : i32
    %0 = arith.cmpi eq, %arg1, %c0_i32 : i32
    %1 = arith.extui %0 : i1 to i32
    %c0_i32_0 = arith.constant 0 : i32
    %2 = arith.cmpi ne, %1, %c0_i32_0 : i32
    scf.if %2 {
      %c0_18 = arith.constant 0 : index
      %c0_19 = arith.constant 0 : index
      %26 = vector.load %arg6[%c0_18, %c0_19] : memref<1x128xf32, #tpu.memory_space<vmem>>, vector<1x128xf32>
      %27 = vector.shape_cast %26 : vector<1x128xf32> to vector<1x128xf32>
      %28 = vector.broadcast %27 : vector<1x128xf32> to vector<16x128xf32>
      %c0_20 = arith.constant 0 : index
      %c0_21 = arith.constant 0 : index
      %29 = vector.load %arg8[%c0_20, %c0_21] : memref<16x128xf32, #tpu.memory_space<vmem>>, vector<16x128xf32>
      tpu.vector_store %arg8[%c0_20, %c0_21], %28 {strides = array<i32>} : memref<16x128xf32, #tpu.memory_space<vmem>>, vector<16x128xf32>,
    } else {
    }
    %c0 = arith.constant 0 : index
    %c0_1 = arith.constant 0 : index
    %3 = vector.load %arg2[%c0, %c0_1] : memref<16x128xbf16, #tpu.memory_space<vmem>>, vector<16x128xbf16>
    %c0_2 = arith.constant 0 : index
    %c0_3 = arith.constant 0 : index
    %4 = vector.load %arg3[%c0_2, %c0_3] : memref<128x128xbf16, #tpu.memory_space<vmem>>, vector<128x128xbf16>
    %cst = arith.constant dense<0.000000e+00> : vector<16x128xf32>
    %5 = tpu.matmul %3, %4, %cst {dimension_numbers = #tpu.dot_dimension_numbers<[1], [0], [0], [1], [0, 0, 1, 1], [], []>} : vector<16x128xbf16>, vector<128x128xbf16>, vector<16x128xf32> -> vector<16x128xf32>
    %c0_4 = arith.constant 0 : index
    %c0_5 = arith.constant 0 : index
    %6 = vector.load %arg4[%c0_4, %c0_5] : memref<1x128xf32, #tpu.memory_space<vmem>>, vector<1x128xf32>
    %7 = vector.broadcast %6 : vector<1x128xf32> to vector<16x128xf32>
    %8 = arith.addf %5, %7 : vector<16x128xf32>
    %cst_6 = arith.constant 5.000000e-01 : f32
    %9 = vector.broadcast %cst_6 : f32 to vector<16x128xf32>
    %10 = arith.mulf %9, %8 : vector<16x128xf32>
    %cst_7 = arith.constant 0.707106769 : f32
    %11 = vector.broadcast %cst_7 : f32 to vector<16x128xf32>
    %12 = arith.mulf %8, %11 : vector<16x128xf32>
    %13 = math.erf %12 : vector<16x128xf32>
    %cst_8 = arith.constant 1.000000e+00 : f32
    %14 = vector.broadcast %cst_8 : f32 to vector<16x128xf32>
    %15 = arith.addf %14, %13 : vector<16x128xf32>
    %16 = arith.mulf %10, %15 : vector<16x128xf32>
    %c0_9 = arith.constant 0 : index
    %c0_10 = arith.constant 0 : index
    %17 = vector.load %arg8[%c0_9, %c0_10] : memref<16x128xf32, #tpu.memory_space<vmem>>, vector<16x128xf32>
    %18 = arith.truncf %16 : vector<16x128xf32> to vector<16x128xbf16>
    %c0_11 = arith.constant 0 : index
    %c0_12 = arith.constant 0 : index
    %19 = vector.load %arg5[%c0_11, %c0_12] : memref<128x128xbf16, #tpu.memory_space<vmem>>, vector<128x128xbf16>
    %cst_13 = arith.constant dense<0.000000e+00> : vector<16x128xf32>
    %20 = tpu.matmul %18, %19, %cst_13 {dimension_numbers = #tpu.dot_dimension_numbers<[1], [0], [0], [1], [0, 0, 1, 1], [], []>} : vector<16x128xbf16>, vector<128x128xbf16>, vector<16x128xf32> -> vector<16x128xf32>
    %21 = arith.addf %17, %20 : vector<16x128xf32>
    %c0_14 = arith.constant 0 : index
    %c0_15 = arith.constant 0 : index
    %22 = vector.load %arg8[%c0_14, %c0_15] : memref<16x128xf32, #tpu.memory_space<vmem>>, vector<16x128xf32>
    tpu.vector_store %arg8[%c0_14, %c0_15], %21 {strides = array<i32>} : memref<16x128xf32, #tpu.memory_space<vmem>>, vector<16x128xf32>,
    %c0_i32_16 = arith.constant 0 : i32
    %23 = arith.cmpi eq, %arg1, %c0_i32_16 : i32
    %24 = arith.extui %23 : i1 to i32
    %c0_i32_17 = arith.constant 0 : i32
    %25 = arith.cmpi ne, %24, %c0_i32_17 : i32
    scf.if %25 {
      %c0_18 = arith.constant 0 : index
      %c0_19 = arith.constant 0 : index
      %26 = vector.load %arg8[%c0_18, %c0_19] : memref<16x128xf32, #tpu.memory_space<vmem>>, vector<16x128xf32>
      %c0_20 = arith.constant 0 : index
      %c0_21 = arith.constant 0 : index
      %27 = vector.load %arg7[%c0_20, %c0_21] : memref<16x128xf32, #tpu.memory_space<vmem>>, vector<16x128xf32>
      tpu.vector_store %arg7[%c0_20, %c0_21], %26 {strides = array<i32>} : memref<16x128xf32, #tpu.memory_space<vmem>>, vector<16x128xf32>,
    } else {
    }
    return
  }
  func.func @transform_0(%arg0: i32, %arg1: i32) -> (i32, i32) {
    %c0_i32 = arith.constant 0 : i32
    %c0_i32_0 = arith.constant 0 : i32
    return %arg0, %c0_i32 : i32, i32
  }
  func.func @transform_1(%arg0: i32, %arg1: i32) -> (i32, i32) {
    %c0_i32 = arith.constant 0 : i32
    %c0_i32_0 = arith.constant 0 : i32
    return %c0_i32, %arg1 : i32, i32
  }
  func.func @transform_2(%arg0: i32, %arg1: i32) -> (i32, i32) {
    %c0_i32 = arith.constant 0 : i32
    %c0_i32_0 = arith.constant 0 : i32
    return %c0_i32, %arg1 : i32, i32
  }
  func.func @transform_3(%arg0: i32, %arg1: i32) -> (i32, i32) {
    %c0_i32 = arith.constant 0 : i32
    %c0_i32_0 = arith.constant 0 : i32
    return %arg1, %c0_i32 : i32, i32
  }
  func.func @transform_4(%arg0: i32, %arg1: i32) -> (i32, i32) {
    %c0_i32 = arith.constant 0 : i32
    %c0_i32_0 = arith.constant 0 : i32
    %c0_i32_1 = arith.constant 0 : i32
    return %c0_i32, %c0_i32_0 : i32, i32
  }
  func.func @transform_5(%arg0: i32, %arg1: i32) -> (i32, i32) {
    %c0_i32 = arith.constant 0 : i32
    %c0_i32_0 = arith.constant 0 : i32
    return %arg0, %c0_i32 : i32, i32
  }
}

</mosaic_0001>

<bundles_post_ra>
// kernel: feed_forward.1
= control target key start
LH: loop header
LB: loop body
LE: loop exit
PB: predicated region body
PF: predicated region fallthrough
CT: control target
= control target key end

     0   :  { %s508_s1 = inlined_call_operand.vmem [shape: bf16[128,128], index: 1, kind: input, shape index: {}]   ;;  %s509_s2 = inlined_call_operand.vmem [shape: f32[1,128], index: 2, kind: input, shape index: {}]   ;;  %s510_s0 = inlined_call_operand.vmem [shape: bf16[16,128], index: 0, kind: input, shape index: {}]   ;;  %s511_s4 = inlined_call_operand.vmem [shape: f32[1,128], index: 4, kind: input, shape index: {}]   ;;  %s512_s3 = inlined_call_operand.vmem [shape: bf16[128,128], index: 3, kind: input, shape index: {}]   ;;  %s513_s5 = inlined_call_operand.vmem [shape: f32[16,128], index: 5, kind: output, shape index: {}]  }
   0x1   :  { %v382_v0 = vld [vmem:[%s508_s1 + $0x38] sm:$0xff]  ;;  %v381_v1 = vld [vmem:[%s508_s1 + $0x30] sm:$0xff]  ;;  %v380_v2 = vld [vmem:[%s508_s1 + $0x28] sm:$0xff] }
   0x2   :  { %106 = vmatpush.bf16.msra.mxu0 %v382_v0  ;;  %v379_v3 = vld [vmem:[%s508_s1 + $0x20] sm:$0xff]  ;;  %v378_v4 = vld [vmem:[%s508_s1 + $0x18] sm:$0xff]  ;;  %v377_v5 = vld [vmem:[%s508_s1 + $0x10] sm:$0xff] }
   0x3   :  { %v376_v6 = vld [vmem:[%s508_s1 + $0x8] sm:$0xff]  ;;  %v375_v7 = vld [vmem:[%s508_s1] sm:$0xff]  ;;  %v390_v10 = vld [vmem:[%s512_s3 + $0x38] sm:$0xff] }
   0x4   :  { %v374_v8 = vld [vmem:[%s510_s0] sm:$0xff]  ;;  %275 = vmatpush.bf16.msra.mxu1 %v390_v10  ;;  %v389_v14 = vld [vmem:[%s512_s3 + $0x30] sm:$0xff]  ;;  %v388_v16 = vld [vmem:[%s512_s3 + $0x28] sm:$0xff] }
   0x5   :  { %v391_v9 = vld [vmem:[%s509_s2] ss:$0 sm:$0xff]  ;;  %v386_v27 = vld [vmem:[%s512_s3 + $0x18] sm:$0xff]  ;;  %v385_v33 = vld [vmem:[%s512_s3 + $0x10] sm:$0xff] }
   0x6   :  { %107 = vmatpush.bf16.msra.mxu0 %v381_v1  ;;  %v387_v21 = vld [vmem:[%s512_s3 + $0x20] sm:$0xff]  ;;  %v384_v41 = vld [vmem:[%s512_s3 + $0x8] sm:$0xff] }
   0x7   :  { %v383_v48 = vld [vmem:[%s512_s3] sm:$0xff] }
   0x8   :  { %276 = vmatpush.bf16.msra.mxu1 %v389_v14 }
   0xa   :  { %108 = vmatpush.bf16.msra.mxu0 %v380_v2 }
   0xc   :  { %277 = vmatpush.bf16.msra.mxu1 %v388_v16 }
   0xe   :  { %109 = vmatpush.bf16.msra.mxu0 %v379_v3 }
  0x10   :  { %278 = vmatpush.bf16.msra.mxu1 %v387_v21 }
  0x12   :  { %110 = vmatpush.bf16.msra.mxu0 %v378_v4 }
  0x14   :  { %279 = vmatpush.bf16.msra.mxu1 %v386_v27 }
  0x16   :  { %111 = vmatpush.bf16.msra.mxu0 %v377_v5 }
  0x18   :  { %280 = vmatpush.bf16.msra.mxu1 %v385_v33 }
  0x1a   :  { %112 = vmatpush.bf16.msra.mxu0 %v376_v6 }
  0x1c   :  { %281 = vmatpush.bf16.msra.mxu1 %v384_v41 }
  0x1e   :  { %113 = vmatpush.bf16.msra.mxu0 %v375_v7 }
  0x20   :  { %282 = vmatpush.bf16.msra.mxu1 %v383_v48 }
  0x21   :  { %114 = vmatmul.bf16.vlgmr.msra.gmra.mxu0 %v374_v8 }
  0x9e   :  { %v115_v11 = vpop.f32.mrf.mxu0 }
  0x9f   :  { %v460_v12 = vadd.f32 %v391_v9, %v115_v11 }
  0xa1   :  { %v463_v13 = vmul.f32 0.70710677, %v460_v12 }
  0xa3   :  { %v124_v15 = vmul.f32 %v463_v13, %v463_v13 }
  0xa5   :  { %v125_v17 = vmin.f32 %v124_v15, 16.0 }
  0xa6   :  { %v117_v18 = vpop.f32.mrf.mxu0 }
  0xa7   :  { %v126_v19 = vmul.f32 2.1237322e-06, %v125_v17  ;;  %v473_v20 = vadd.f32 %v391_v9, %v117_v18  ;;  %v137_v22 = vmul.f32 3.8918573e-05, %v125_v17 }
  0xa9   :  { %v127_v23 = vadd.f32 0.00028619796, %v126_v19  ;;  %v479_v24 = vmul.f32 0.70710677, %v473_v20  ;;  %v138_v25 = vadd.f32 0.001143296, %v137_v22 }
  0xab   :  { %v164_v26 = vmul.f32 %v479_v24, %v479_v24  ;;  %v128_v28 = vmul.f32 %v127_v23, %v125_v17  ;;  %v139_v29 = vmul.f32 %v138_v25, %v125_v17 }
  0xad   :  { %v165_v30 = vmin.f32 %v164_v26, 16.0  ;;  %v140_v31 = vadd.f32 0.014752088, %v139_v29  ;;  %v129_v35 = vadd.f32 0.0036580483, %v128_v28 }
  0xaf   :  { %v166_v32 = vmul.f32 2.1237322e-06, %v165_v30  ;;  %v177_v34 = vmul.f32 3.8918573e-05, %v165_v30  ;;  %v141_v36 = vmul.f32 %v140_v31, %v125_v17  ;;  %v130_v43 = vmul.f32 %v129_v35, %v125_v17 }
  0xb0   :  { %v121_v35 = vmul.f32 0.5, %v473_v20 }
  0xb1   :  { %v167_v37 = vadd.f32 0.00028619796, %v166_v32  ;;  %v178_v38 = vadd.f32 0.001143296, %v177_v34  ;;  %v142_v39 = vadd.f32 0.112945676, %v141_v36 }
  0xb2   :  { %v131_v50 = vadd.f32 0.05243302, %v130_v43  ;;  %v120_v34 = vmul.f32 0.5, %v460_v12 }
  0xb3   :  { %v168_v40 = vmul.f32 %v167_v37, %v165_v30  ;;  %v179_v42 = vmul.f32 %v178_v38, %v165_v30  ;;  %v143_v44 = vmul.f32 %v142_v39, %v125_v17 }
  0xb4   :  { %v132_v56 = vmul.f32 %v131_v50, %v125_v17 }
  0xb5   :  { %v169_v45 = vadd.f32 0.0036580483, %v168_v40  ;;  %v180_v46 = vadd.f32 0.014752088, %v179_v42  ;;  %v144_v47 = vadd.f32 0.4994258, %v143_v44 }
  0xb6   :  { %v133_v60 = vadd.f32 0.18741608, %v132_v56 }
  0xb7   :  { %v181_v49 = vmul.f32 %v180_v46, %v165_v30  ;;  %v145_v51 = vmul.f32 %v144_v47, %v125_v17  ;;  %v170_v52 = vmul.f32 %v169_v45, %v165_v30 }
  0xb8   :  { %v134_v1 = vmul.f32 %v133_v60, %v125_v17 }
  0xb9   :  { %v182_v53 = vadd.f32 0.112945676, %v181_v49  ;;  %v146_v54 = vadd.f32 1.0, %v145_v51  ;;  %v171_v57 = vadd.f32 0.05243302, %v170_v52 }
  0xba   :  { %v135_v7 = vadd.f32 1.1283791, %v134_v1 }
  0xbb   :  { %v183_v55 = vmul.f32 %v182_v53, %v165_v30  ;;  %393 = vrcp.f32 %v146_v54  ;;  %v172_v61 = vmul.f32 %v171_v57, %v165_v30  ;;  %v158_v4 = vand.u32 2147483648, %v146_v54 }
  0xbc   :  { %v156_v6 = vand.u32 2147483647, %v146_v54  ;;  %vm152_vm1 = vweird.f32 %v146_v54  ;;  %v136_v16 = vmul.f32 %v135_v7, %v463_v13 }
  0xbd   :  { %v184_v58 = vadd.f32 0.4994258, %v183_v55  ;;  %v173_v2 = vadd.f32 0.18741608, %v172_v61  ;;  %v159_v11 = vor.u32 1.1754944e-38, %v158_v4 }
  0xbe   :  { %vm157_vm3 = vcmp.eq.f32.partialorder %v156_v6, 8.507059e+37 }
  0xbf   :  { %v185_v59 = vmul.f32 %v184_v58, %v165_v30  ;;  %v174_v9 = vmul.f32 %v173_v2, %v165_v30 }
  0xc1   :  { %v186_v62 = vadd.f32 1.0, %v185_v59  ;;  %v394_v63 = vpop.eup %393  ;;  %v175_v19 = vadd.f32 1.1283791, %v174_v9 }
  0xc2   :  { %v148_v0 = vmul.f32 %v394_v63, %v146_v54  ;;  %vm153_vm0 = vweird.f32 %v394_v63 }
  0xc3   :  { %395 = vrcp.f32 %v186_v62  ;;  %vm154_vm2 = vmor %vm152_vm1, %vm153_vm0  ;;  %v198_v21 = vand.u32 2147483648, %v186_v62  ;;  %v196_v25 = vand.u32 2147483647, %v186_v62  ;;  %vm192_vm5 = vweird.f32 %v186_v62 }
  0xc4   :  { %v149_v3 = vsub.f32 1.0, %v148_v0  ;;  %v176_v28 = vmul.f32 %v175_v19, %v479_v24  ;;  %v392_v24 = vld [vmem:[%s511_s4] ss:$0 sm:$0xff] }
  0xc5   :  { %v199_v27 = vor.u32 1.1754944e-38, %v198_v21  ;;  %vm197_vm7 = vcmp.eq.f32.partialorder %v196_v25, 8.507059e+37 }
  0xc6   :  { %v150_v5 = vmul.f32 %v394_v63, %v149_v3 }
  0xc8   :  { %v151_v10 = vadd.f32 %v394_v63, %v150_v5 }
  0xc9   :  { %v396_v8 = vpop.eup %395 }
  0xca   :  { %v188_v14 = vmul.f32 %v396_v8, %v186_v62  ;;  %v155_v15 = vsel %vm154_vm2, %v394_v63, %v151_v10  ;;  %vm193_vm4 = vweird.f32 %v396_v8 }
  0xcb   :  { %v160_v18 = vsel %vm157_vm3, %v159_v11, %v155_v15  ;;  %vm194_vm6 = vmor %vm192_vm5, %vm193_vm4 }
  0xcc   :  { %v189_v17 = vsub.f32 1.0, %v188_v14  ;;  %v161_v22 = vmul.f32 %v160_v18, %v136_v16 }
  0xce   :  { %v190_v23 = vmul.f32 %v396_v8, %v189_v17  ;;  %v340_v29 = vclamps-f32 %v161_v22, 1.0 }
  0xd0   :  { %v191_v26 = vadd.f32 %v396_v8, %v190_v23  ;;  %v204_v33 = vadd.f32 1.0, %v340_v29 }
  0xd2   :  { %v195_v30 = vsel %vm194_vm6, %v396_v8, %v191_v26  ;;  %v206_v37 = vmul.f32 %v204_v33, %v120_v34 }
  0xd3   :  { %v200_v31 = vsel %vm197_vm7, %v199_v27, %v195_v30 }
  0xd4   :  { %v201_v32 = vmul.f32 %v200_v31, %v176_v28 }
  0xd6   :  { %v341_v13 = vclamps-f32 %v201_v32, 1.0 }
  0xd8   :  { %v205_v36 = vadd.f32 1.0, %v341_v13 }
  0xda   :  { %v207_v38 = vmul.f32 %v205_v36, %v121_v35 }
  0xdc   :  { %v210_v39 = vpack.c.bf16 %v207_v38, %v206_v37 }
  0xde   :  { %283 = vmatmul.bf16.vlgmr.msra.gmra.mxu1 %v210_v39 }
 0x15b   :  { %v284_v40 = vpop.f32.mrf.mxu1 }
 0x15c   :  { %v289_v41 = vadd.f32 %v392_v24, %v284_v40 }
 0x15e   :  { %298 = vst [vmem:[%s513_s5] sm:$0xff] %v289_v41 }
 0x163   :  { %v286_v42 = vpop.f32.mrf.mxu1 }
 0x164   :  { %v290_v43 = vadd.f32 %v392_v24, %v286_v42 }
 0x166   :  { %299 = vst [vmem:[%s513_s5 + $0x8] sm:$0xff] %v290_v43 }

</bundles_post_ra>
